<compile_context>
chip_gen: v7x
topology: tpu7x:2x2x1
jax: 0.10.0
libtpu: 0.0.40
codegen_flags: <defaults>
</compile_context>

<pallas_src>
import functools

import jax
import jax.numpy as jnp
from jax.experimental import pallas as pl
from jax.experimental.pallas import tpu as pltpu


# ----------------------------------------------------------------------------
# helpers
# ----------------------------------------------------------------------------
def _round_up(x, m):
    return ((x + m - 1) // m) * m


def _pad2(x, rows, cols):
    r, c = x.shape
    return jnp.pad(x, ((0, rows - r), (0, cols - c)))


def _pick_tile(n_pad, preferred, min_tiles=1):
    """Largest multiple of 128 <= preferred that divides n_pad, keeping at
    least `min_tiles` tiles along the axis (v7x megacore load balance)."""
    cap = max(128, ((n_pad // max(min_tiles, 1)) // 128) * 128)
    t = max(128, (min(preferred, cap, n_pad) // 128) * 128)
    while n_pad % t:
        t -= 128
    return t


def _vmem_budget_bytes():
    """Generation-aware scoped-VMEM budget: ~75% of physical, capped at 100 MiB.
    -> ~48 MiB on v7x (64 MiB physical), ~96 MiB on v4/v5e/v6e (128 MiB)."""
    phys = None
    try:
        phys = int(pltpu.get_tpu_info().vmem_capacity_bytes)
    except Exception:
        phys = None
    if not phys:
        try:
            kind = jax.devices()[0].device_kind.lower()
        except Exception:
            kind = ""
        phys = (128 << 20) if any(v in kind for v in ("v4", "v5", "v6")) else (64 << 20)
    return min(phys * 3 // 4, 100 << 20)


# ----------------------------------------------------------------------------
# Pallas kernels
# ----------------------------------------------------------------------------
def _xw_kernel(x_ref, w_ref, o_ref):
    # Feature transform: O = X @ W1   (bf16 operands, f32 accumulate on MXU)
    o_ref[...] = jnp.dot(
        x_ref[...], w_ref[...], preferred_element_type=jnp.float32
    ).astype(o_ref.dtype)


def _agg_relu_w2_kernel(a_ref, h_ref, b1_ref, w2_ref, o_ref, acc_ref,
                        *, tk, h_resident):
    # acc += A_panel @ XW1_panel over reduction tiles k; on the last tile apply
    # bias + ReLU (f32 VPU) and the layer-2 feature transform W2.
    k = pl.program_id(1)

    @pl.when(k == 0)
    def _init():
        acc_ref[...] = jnp.zeros_like(acc_ref)

    if h_resident:
        # XW1 is whole-array VMEM-resident; slice the reduction panel in-kernel.
        h_panel = h_ref[pl.ds(pl.multiple_of(k * tk, 128), tk), :]
    else:
        h_panel = h_ref[...]
    acc_ref[...] += jnp.dot(a_ref[...], h_panel,
                            preferred_element_type=jnp.float32)

    @pl.when(k == pl.num_programs(1) - 1)
    def _finalize():
        h = jnp.maximum(acc_ref[...] + b1_ref[...], 0.0)      # f32 math
        o_ref[...] = jnp.dot(
            h.astype(jnp.bfloat16), w2_ref[...],
            preferred_element_type=jnp.float32,
        ).astype(o_ref.dtype)


def _agg_bias_kernel(a_ref, g_ref, b2_ref, o_ref, acc_ref, *, tk, g_resident):
    # acc += A_panel @ G_panel over reduction tiles; finalize with bias add.
    k = pl.program_id(1)

    @pl.when(k == 0)
    def _init():
        acc_ref[...] = jnp.zeros_like(acc_ref)

    if g_resident:
        g_panel = g_ref[pl.ds(pl.multiple_of(k * tk, 128), tk), :]
    else:
        g_panel = g_ref[...]
    acc_ref[...] += jnp.dot(a_ref[...], g_panel,
                            preferred_element_type=jnp.float32)

    @pl.when(k == pl.num_programs(1) - 1)
    def _finalize():
        o_ref[...] = (acc_ref[...] + b2_ref[...]).astype(o_ref.dtype)


# ----------------------------------------------------------------------------
# Wrapper: padding, tiling, residency decisions, and the three pallas_calls
# ----------------------------------------------------------------------------
@jax.jit
def gnn_encoder_pallas(a_hat, x, w1, b1, w2, b2):
    n, f_in = x.shape
    hidden = w1.shape[1]
    out_dim = w2.shape[1]

    # Lane-dense padding (multiples of 128) for every matmul dimension.
    n_pad = _round_up(n, 128)
    f_pad = _round_up(f_in, 128)
    h_pad = _round_up(hidden, 128)
    o_pad = _round_up(out_dim, 128)

    # A_hat may already arrive padded + bf16 from gcn_normalized_adjacency,
    # avoiding an extra N^2 pad+cast HBM round trip here.
    if a_hat.shape == (n_pad, n_pad) and a_hat.dtype == jnp.bfloat16:
        a_p = a_hat
    else:
        a_p = _pad2(a_hat, n_pad, n_pad).astype(jnp.bfloat16)

    x_p = _pad2(x, n_pad, f_pad).astype(jnp.bfloat16)
    w1_p = _pad2(w1, f_pad, h_pad).astype(jnp.bfloat16)
    w2_p = _pad2(w2, h_pad, o_pad).astype(jnp.bfloat16)
    b1_p = _pad2(jnp.asarray(b1, jnp.float32).reshape(1, -1), 1, h_pad)
    b2_p = _pad2(jnp.asarray(b2, jnp.float32).reshape(1, -1), 1, o_pad)

    budget = _vmem_budget_bytes()

    def fits(nbytes):
        return nbytes + (4 << 20) <= budget   # leave slack for compiler scratch

    # Tile selection: >=2 row tiles (v7x has 2 TCs), big tiles for HBM roofline.
    tm = _pick_tile(n_pad, 512, min_tiles=2)     # row tile, kernels 2/3
    tk = _pick_tile(n_pad, 1024)                 # reduction tile (A cols)
    tm1 = _pick_tile(n_pad, 2048, min_tiles=2)   # row tile, kernel 1

    def k1_bytes(t):  # double-buffered X / W1 / out tiles
        return 2 * t * f_pad * 2 + 2 * f_pad * h_pad * 2 + 2 * t * h_pad * 2

    while tm1 > 128 and not fits(k1_bytes(tm1)):
        tm1 = _pick_tile(n_pad, tm1 - 128, min_tiles=2)

    # Residency checks for the narrow streamed operands (counted double-buffered
    # even though the constant index_map only fetches them once).
    def k2_bytes(resident):
        h_bytes = 2 * n_pad * h_pad * 2 if resident else 2 * tk * h_pad * 2
        return (2 * tm * tk * 2 + h_bytes + 2 * h_pad * o_pad * 2
                + 2 * tm * o_pad * 2 + tm * h_pad * 4 + 8 * h_pad * 4)

    def k3_bytes(resident):
        g_bytes = 2 * n_pad * o_pad * 2 if resident else 2 * tk * o_pad * 2
        return (2 * tm * tk * 2 + g_bytes + 2 * tm * o_pad * 4
                + tm * o_pad * 4 + 8 * o_pad * 4)

    h_resident = fits(k2_bytes(True))
    g_resident = fits(k3_bytes(True))

    params_1d = pltpu.CompilerParams(
        dimension_semantics=("parallel",), vmem_limit_bytes=budget)
    params_2d = pltpu.CompilerParams(
        dimension_semantics=("parallel", "arbitrary"), vmem_limit_bytes=budget)

    # ---- kernel 1: XW1 = X @ W1 ------------------------------------------------
    xw1 = pl.pallas_call(
        _xw_kernel,
        out_shape=jax.ShapeDtypeStruct((n_pad, h_pad), jnp.bfloat16),
        grid=(n_pad // tm1,),
        in_specs=[
            pl.BlockSpec((tm1, f_pad), lambda i: (i, 0)),
            pl.BlockSpec((f_pad, h_pad), lambda i: (0, 0)),     # W1 resident
        ],
        out_specs=pl.BlockSpec((tm1, h_pad), lambda i: (i, 0)),
        compiler_params=params_1d,
        cost_estimate=pl.CostEstimate(
            flops=2 * n_pad * f_pad * h_pad,
            transcendentals=0,
            bytes_accessed=2 * (n_pad * f_pad + f_pad * h_pad + n_pad * h_pad),
        ),
    )(x_p, w1_p)

    # ---- kernel 2: G = relu(A_hat @ XW1 + b1) @ W2 ------------------------------
    # TODO(synk): profile-gate pl.Buffered(3) on the streamed A_hat spec if a
    # bundle dump shows exposed DMA start latency.
    if h_resident:
        h_spec = pl.BlockSpec((n_pad, h_pad), lambda i, k: (0, 0))   # resident
        h_read = n_pad * h_pad * 2
    else:
        h_spec = pl.BlockSpec((tk, h_pad), lambda i, k: (k, 0))      # streamed
        h_read = (n_pad // tm) * n_pad * h_pad * 2

    g = pl.pallas_call(
        functools.partial(_agg_relu_w2_kernel, tk=tk, h_resident=h_resident),
        out_shape=jax.ShapeDtypeStruct((n_pad, o_pad), jnp.bfloat16),
        grid=(n_pad // tm, n_pad // tk),
        in_specs=[
            pl.BlockSpec((tm, tk), lambda i, k: (i, k)),        # A_hat panel
            h_spec,                                             # XW1
            pl.BlockSpec((1, h_pad), lambda i, k: (0, 0)),      # b1 (resident)
            pl.BlockSpec((h_pad, o_pad), lambda i, k: (0, 0)),  # W2 (resident)
        ],
        out_specs=pl.BlockSpec((tm, o_pad), lambda i, k: (i, 0)),
        scratch_shapes=[pltpu.VMEM((tm, h_pad), jnp.float32)],
        compiler_params=params_2d,
        cost_estimate=pl.CostEstimate(
            flops=2 * n_pad * n_pad * h_pad + 2 * n_pad * h_pad * o_pad,
            transcendentals=0,
            bytes_accessed=(n_pad * n_pad * 2 + h_read + h_pad * o_pad * 2
                            + n_pad * o_pad * 2 + h_pad * 4),
        ),
    )(a_p, xw1, b1_p, w2_p)

    # ---- kernel 3: OUT = A_hat @ G + b2 -----------------------------------------
    if g_resident:
        g_spec = pl.BlockSpec((n_pad, o_pad), lambda i, k: (0, 0))   # resident
        g_read = n_pad * o_pad * 2
    else:
        g_spec = pl.BlockSpec((tk, o_pad), lambda i, k: (k, 0))      # streamed
        g_read = (n_pad // tm) * n_pad * o_pad * 2

    out_pad = pl.pallas_call(
        functools.partial(_agg_bias_kernel, tk=tk, g_resident=g_resident),
        out_shape=jax.ShapeDtypeStruct((n_pad, o_pad), jnp.float32),
        grid=(n_pad // tm, n_pad // tk),
        in_specs=[
            pl.BlockSpec((tm, tk), lambda i, k: (i, k)),        # A_hat panel
            g_spec,                                             # G
            pl.BlockSpec((1, o_pad), lambda i, k: (0, 0)),      # b2 (resident)
        ],
        out_specs=pl.BlockSpec((tm, o_pad), lambda i, k: (i, 0)),
        scratch_shapes=[pltpu.VMEM((tm, o_pad), jnp.float32)],
        compiler_params=params_2d,
        cost_estimate=pl.CostEstimate(
            flops=2 * n_pad * n_pad * o_pad,
            transcendentals=0,
            bytes_accessed=(n_pad * n_pad * 2 + g_read + o_pad * 4
                            + n_pad * o_pad * 4),
        ),
    )(a_p, g, b2_p)

    return out_pad[:n, :out_dim]


# ----------------------------------------------------------------------------
# Plain-JAX glue: edge_index -> dense GCN-normalized adjacency (self-loops,
# D^-1/2 (A+I) D^-1/2), matching torch_geometric.nn.GCNConv defaults.
# Built directly at the padded size and in bf16 so the Pallas wrapper does not
# need another N^2 pad+cast pass.  Duplicate edges accumulate weight, same as
# PyG's scatter-add message passing.
# TODO(synk): for sparse graphs, replace the dense A_hat with a block-sparse
# gather formulation (PrefetchScalarGridSpec-driven a_ref index_map).
# ----------------------------------------------------------------------------
def gcn_normalized_adjacency(edge_index, num_nodes, pad_to=None,
                             dtype=jnp.bfloat16):
    n_pad = num_nodes if pad_to is None else pad_to
    src = edge_index[0]
    dst = edge_index[1]
    loops = jnp.arange(num_nodes, dtype=edge_index.dtype)
    src = jnp.concatenate([src, loops])
    dst = jnp.concatenate([dst, loops])
    adj = jnp.zeros((n_pad, n_pad), jnp.float32).at[dst, src].add(1.0)
    deg = adj.sum(axis=1)                       # padded rows: deg == 0
    d_inv_sqrt = jnp.where(deg > 0.0, 1.0 / jnp.sqrt(deg), 0.0)
    a_hat = d_inv_sqrt[:, None] * adj * d_inv_sqrt[None, :]
    return a_hat.astype(dtype)


# ----------------------------------------------------------------------------
# Pure-JAX f32 reference
# ----------------------------------------------------------------------------
def gnn_encoder_ref(a_hat, x, w1, b1, w2, b2):
    h = a_hat @ (x @ w1) + b1[None, :]
    h = jnp.maximum(h, 0.0)
    return a_hat @ (h @ w2) + b2[None, :]


if __name__ == "__main__":
    # Small deterministic problem: 16 nodes, input_dim=8, hidden_dim=32, output_dim=16
    num_nodes = 16
    input_dim = 8
    hidden_dim = 32
    output_dim = 16

    key = jax.random.PRNGKey(0)
    k_x, k_w1, k_w2, k_b1, k_b2 = jax.random.split(key, 5)

    x = jax.random.normal(k_x, (num_nodes, input_dim), dtype=jnp.float32)

    # Ring graph edges (both directions), shape (2, 2*N)
    idx = jnp.arange(num_nodes, dtype=jnp.int32)
    nxt = (idx + 1) % num_nodes
    edge_index = jnp.stack(
        [jnp.concatenate([idx, nxt]), jnp.concatenate([nxt, idx])], axis=0
    )

    # Deterministic glorot-like weights; small nonzero biases to exercise the bias path.
    scale1 = jnp.sqrt(6.0 / (input_dim + hidden_dim))
    scale2 = jnp.sqrt(6.0 / (hidden_dim + output_dim))
    w1 = jax.random.uniform(k_w1, (input_dim, hidden_dim),
                            minval=-scale1, maxval=scale1, dtype=jnp.float32)
    w2 = jax.random.uniform(k_w2, (hidden_dim, output_dim),
                            minval=-scale2, maxval=scale2, dtype=jnp.float32)
    b1 = 0.1 * jax.random.normal(k_b1, (hidden_dim,), dtype=jnp.float32)
    b2 = 0.1 * jax.random.normal(k_b2, (output_dim,), dtype=jnp.float32)

    n_pad = _round_up(num_nodes, 128)
    # Kernel input: adjacency built once, already padded + bf16.
    a_hat_bf16 = gcn_normalized_adjacency(edge_index, num_nodes,
                                          pad_to=n_pad, dtype=jnp.bfloat16)
    # Reference uses full-precision adjacency.
    a_hat_f32 = gcn_normalized_adjacency(edge_index, num_nodes,
                                         dtype=jnp.float32)

    out = gnn_encoder_pallas(a_hat_bf16, x, w1, b1, w2, b2)
    out = jax.block_until_ready(out)

    ref = gnn_encoder_ref(a_hat_f32, x, w1, b1, w2, b2)
    assert out.shape == (num_nodes, output_dim)
    # bf16 matmul operands / f32 accumulation -> loosened tolerance vs f32 ref.
    assert jnp.allclose(out, ref, atol=5e-2, rtol=5e-2), (
        float(jnp.max(jnp.abs(out - ref))))

    print("KERNEL_OK")
</pallas_src>

<mosaic_0001>
module attributes {stable_mosaic.version = 11 : i64} {
  func.func @_xw_kernel(%arg0: i32, %arg1: memref<128x128xbf16, #tpu.memory_space<vmem>>, %arg2: memref<128x128xbf16, #tpu.memory_space<vmem>>, %arg3: memref<128x128xbf16, #tpu.memory_space<vmem>>) attributes {dimension_semantics = [#tpu.dimension_semantics<parallel>], iteration_bounds = array<i64: 1>, scalar_prefetch = 0 : i64, scratch_operands = 0 : i64, tpu.core_type = #tpu.core_type<tc>, window_params = [{transform_indices = @transform_0, window_bounds = array<i64: 128, 128>}, {pipeline_mode = #tpu.pipeline_mode<synchronous>, transform_indices = @transform_1, window_bounds = array<i64: 128, 128>}, {transform_indices = @transform_2, window_bounds = array<i64: 128, 128>}]} {
    %c0 = arith.constant 0 : index
    %c0_0 = arith.constant 0 : index
    %0 = vector.load %arg1[%c0, %c0_0] : memref<128x128xbf16, #tpu.memory_space<vmem>>, vector<128x128xbf16>
    %c0_1 = arith.constant 0 : index
    %c0_2 = arith.constant 0 : index
    %1 = vector.load %arg2[%c0_1, %c0_2] : memref<128x128xbf16, #tpu.memory_space<vmem>>, vector<128x128xbf16>
    %cst = arith.constant dense<0.000000e+00> : vector<128x128xf32>
    %2 = tpu.matmul %0, %1, %cst {dimension_numbers = #tpu.dot_dimension_numbers<[1], [0], [0], [1], [0, 0, 1, 1], [], []>} : vector<128x128xbf16>, vector<128x128xbf16>, vector<128x128xf32> -> vector<128x128xf32>
    %3 = arith.truncf %2 : vector<128x128xf32> to vector<128x128xbf16>
    %c0_3 = arith.constant 0 : index
    %c0_4 = arith.constant 0 : index
    %4 = vector.load %arg3[%c0_3, %c0_4] : memref<128x128xbf16, #tpu.memory_space<vmem>>, vector<128x128xbf16>
    tpu.vector_store %arg3[%c0_3, %c0_4], %3 {strides = array<i32>} : memref<128x128xbf16, #tpu.memory_space<vmem>>, vector<128x128xbf16>,
    return
  }
  func.func @transform_0(%arg0: i32) -> (i32, i32) {
    %c0_i32 = arith.constant 0 : i32
    %c0_i32_0 = arith.constant 0 : i32
    return %arg0, %c0_i32 : i32, i32
  }
  func.func @transform_1(%arg0: i32) -> (i32, i32) {
    %c0_i32 = arith.constant 0 : i32
    %c0_i32_0 = arith.constant 0 : i32
    %c0_i32_1 = arith.constant 0 : i32
    return %c0_i32, %c0_i32_0 : i32, i32
  }
  func.func @transform_2(%arg0: i32) -> (i32, i32) {
    %c0_i32 = arith.constant 0 : i32
    %c0_i32_0 = arith.constant 0 : i32
    return %arg0, %c0_i32 : i32, i32
  }
}

module attributes {stable_mosaic.version = 11 : i64} {
  func.func @_agg_relu_w2_kernel(%arg0: i32, %arg1: i32, %arg2: memref<128x128xbf16, #tpu.memory_space<vmem>>, %arg3: memref<128x128xbf16, #tpu.memory_space<vmem>>, %arg4: memref<1x128xf32, #tpu.memory_space<vmem>>, %arg5: memref<128x128xbf16, #tpu.memory_space<vmem>>, %arg6: memref<128x128xbf16, #tpu.memory_space<vmem>>, %arg7: memref<128x128xf32, #tpu.memory_space<vmem>>) attributes {dimension_semantics = [#tpu.dimension_semantics<parallel>, #tpu.dimension_semantics<arbitrary>], iteration_bounds = array<i64: 1, 1>, scalar_prefetch = 0 : i64, scratch_operands = 1 : i64, tpu.core_type = #tpu.core_type<tc>, window_params = [{transform_indices = @transform_0, window_bounds = array<i64: 128, 128>}, {pipeline_mode = #tpu.pipeline_mode<synchronous>, transform_indices = @transform_1, window_bounds = array<i64: 128, 128>}, {pipeline_mode = #tpu.pipeline_mode<synchronous>, transform_indices = @transform_2, window_bounds = array<i64: 1, 128>}, {pipeline_mode = #tpu.pipeline_mode<synchronous>, transform_indices = @transform_3, window_bounds = array<i64: 128, 128>}, {transform_indices = @transform_4, window_bounds = array<i64: 128, 128>}]} {
    %c0_i32 = arith.constant 0 : i32
    %0 = arith.cmpi eq, %arg1, %c0_i32 : i32
    %1 = arith.extui %0 : i1 to i32
    %c0_i32_0 = arith.constant 0 : i32
    %2 = arith.cmpi ne, %1, %c0_i32_0 : i32
    scf.if %2 {
      %cst_9 = arith.constant 0.000000e+00 : f32
      %15 = vector.broadcast %cst_9 : f32 to vector<128x128xf32>
      %c0_10 = arith.constant 0 : index
      %c0_11 = arith.constant 0 : index
      %16 = vector.load %arg7[%c0_10, %c0_11] : memref<128x128xf32, #tpu.memory_space<vmem>>, vector<128x128xf32>
      tpu.vector_store %arg7[%c0_10, %c0_11], %15 {strides = array<i32>} : memref<128x128xf32, #tpu.memory_space<vmem>>, vector<128x128xf32>,
    } else {
    }
    %c128_i32 = arith.constant 128 : i32
    %3 = arith.muli %arg1, %c128_i32 : i32
    %4 = tpu.assume_multiple %3, 128 : i32
    %5 = arith.index_cast %4 : i32 to index
    %c0 = arith.constant 0 : index
    %6 = vector.load %arg3[%5, %c0] : memref<128x128xbf16, #tpu.memory_space<vmem>>, vector<128x128xbf16>
    %c0_1 = arith.constant 0 : index
    %c0_2 = arith.constant 0 : index
    %7 = vector.load %arg7[%c0_1, %c0_2] : memref<128x128xf32, #tpu.memory_space<vmem>>, vector<128x128xf32>
    %c0_3 = arith.constant 0 : index
    %c0_4 = arith.constant 0 : index
    %8 = vector.load %arg2[%c0_3, %c0_4] : memref<128x128xbf16, #tpu.memory_space<vmem>>, vector<128x128xbf16>
    %cst = arith.constant dense<0.000000e+00> : vector<128x128xf32>
    %9 = tpu.matmul %8, %6, %cst {dimension_numbers = #tpu.dot_dimension_numbers<[1], [0], [0], [1], [0, 0, 1, 1], [], []>} : vector<128x128xbf16>, vector<128x128xbf16>, vector<128x128xf32> -> vector<128x128xf32>
    %10 = arith.addf %7, %9 : vector<128x128xf32>
    %c0_5 = arith.constant 0 : index
    %c0_6 = arith.constant 0 : index
    %11 = vector.load %arg7[%c0_5, %c0_6] : memref<128x128xf32, #tpu.memory_space<vmem>>, vector<128x128xf32>
    tpu.vector_store %arg7[%c0_5, %c0_6], %10 {strides = array<i32>} : memref<128x128xf32, #tpu.memory_space<vmem>>, vector<128x128xf32>,
    %c0_i32_7 = arith.constant 0 : i32
    %12 = arith.cmpi eq, %arg1, %c0_i32_7 : i32
    %13 = arith.extui %12 : i1 to i32
    %c0_i32_8 = arith.constant 0 : i32
    %14 = arith.cmpi ne, %13, %c0_i32_8 : i32
    scf.if %14 {
      %c0_9 = arith.constant 0 : index
      %c0_10 = arith.constant 0 : index
      %15 = vector.load %arg7[%c0_9, %c0_10] : memref<128x128xf32, #tpu.memory_space<vmem>>, vector<128x128xf32>
      %c0_11 = arith.constant 0 : index
      %c0_12 = arith.constant 0 : index
      %16 = vector.load %arg4[%c0_11, %c0_12] : memref<1x128xf32, #tpu.memory_space<vmem>>, vector<1x128xf32>
      %17 = vector.broadcast %16 : vector<1x128xf32> to vector<128x128xf32>
      %18 = arith.addf %15, %17 : vector<128x128xf32>
      %cst_13 = arith.constant 0.000000e+00 : f32
      %19 = vector.broadcast %cst_13 : f32 to vector<128x128xf32>
      %20 = arith.maximumf %18, %19 : vector<128x128xf32>
      %21 = arith.truncf %20 : vector<128x128xf32> to vector<128x128xbf16>
      %c0_14 = arith.constant 0 : index
      %c0_15 = arith.constant 0 : index
      %22 = vector.load %arg5[%c0_14, %c0_15] : memref<128x128xbf16, #tpu.memory_space<vmem>>, vector<128x128xbf16>
      %cst_16 = arith.constant dense<0.000000e+00> : vector<128x128xf32>
      %23 = tpu.matmul %21, %22, %cst_16 {dimension_numbers = #tpu.dot_dimension_numbers<[1], [0], [0], [1], [0, 0, 1, 1], [], []>} : vector<128x128xbf16>, vector<128x128xbf16>, vector<128x128xf32> -> vector<128x128xf32>
      %24 = arith.truncf %23 : vector<128x128xf32> to vector<128x128xbf16>
      %c0_17 = arith.constant 0 : index
      %c0_18 = arith.constant 0 : index
      %25 = vector.load %arg6[%c0_17, %c0_18] : memref<128x128xbf16, #tpu.memory_space<vmem>>, vector<128x128xbf16>
      tpu.vector_store %arg6[%c0_17, %c0_18], %24 {strides = array<i32>} : memref<128x128xbf16, #tpu.memory_space<vmem>>, vector<128x128xbf16>,
    } else {
    }
    return
  }
  func.func @transform_0(%arg0: i32, %arg1: i32) -> (i32, i32) {
    %c0_i32 = arith.constant 0 : i32
    return %arg0, %arg1 : i32, i32
  }
  func.func @transform_1(%arg0: i32, %arg1: i32) -> (i32, i32) {
    %c0_i32 = arith.constant 0 : i32
    %c0_i32_0 = arith.constant 0 : i32
    %c0_i32_1 = arith.constant 0 : i32
    return %c0_i32, %c0_i32_0 : i32, i32
  }
  func.func @transform_2(%arg0: i32, %arg1: i32) -> (i32, i32) {
    %c0_i32 = arith.constant 0 : i32
    %c0_i32_0 = arith.constant 0 : i32
    %c0_i32_1 = arith.constant 0 : i32
    return %c0_i32, %c0_i32_0 : i32, i32
  }
  func.func @transform_3(%arg0: i32, %arg1: i32) -> (i32, i32) {
    %c0_i32 = arith.constant 0 : i32
    %c0_i32_0 = arith.constant 0 : i32
    %c0_i32_1 = arith.constant 0 : i32
    return %c0_i32, %c0_i32_0 : i32, i32
  }
  func.func @transform_4(%arg0: i32, %arg1: i32) -> (i32, i32) {
    %c0_i32 = arith.constant 0 : i32
    %c0_i32_0 = arith.constant 0 : i32
    return %arg0, %c0_i32 : i32, i32
  }
}

module attributes {stable_mosaic.version = 11 : i64} {
  func.func @_agg_bias_kernel(%arg0: i32, %arg1: i32, %arg2: memref<128x128xbf16, #tpu.memory_space<vmem>>, %arg3: memref<128x128xbf16, #tpu.memory_space<vmem>>, %arg4: memref<1x128xf32, #tpu.memory_space<vmem>>, %arg5: memref<128x128xf32, #tpu.memory_space<vmem>>, %arg6: memref<128x128xf32, #tpu.memory_space<vmem>>) attributes {dimension_semantics = [#tpu.dimension_semantics<parallel>, #tpu.dimension_semantics<arbitrary>], iteration_bounds = array<i64: 1, 1>, scalar_prefetch = 0 : i64, scratch_operands = 1 : i64, tpu.core_type = #tpu.core_type<tc>, window_params = [{transform_indices = @transform_0, window_bounds = array<i64: 128, 128>}, {pipeline_mode = #tpu.pipeline_mode<synchronous>, transform_indices = @transform_1, window_bounds = array<i64: 128, 128>}, {pipeline_mode = #tpu.pipeline_mode<synchronous>, transform_indices = @transform_2, window_bounds = array<i64: 1, 128>}, {transform_indices = @transform_3, window_bounds = array<i64: 128, 128>}]} {
    %c0_i32 = arith.constant 0 : i32
    %0 = arith.cmpi eq, %arg1, %c0_i32 : i32
    %1 = arith.extui %0 : i1 to i32
    %c0_i32_0 = arith.constant 0 : i32
    %2 = arith.cmpi ne, %1, %c0_i32_0 : i32
    scf.if %2 {
      %cst_9 = arith.constant 0.000000e+00 : f32
      %15 = vector.broadcast %cst_9 : f32 to vector<128x128xf32>
      %c0_10 = arith.constant 0 : index
      %c0_11 = arith.constant 0 : index
      %16 = vector.load %arg6[%c0_10, %c0_11] : memref<128x128xf32, #tpu.memory_space<vmem>>, vector<128x128xf32>
      tpu.vector_store %arg6[%c0_10, %c0_11], %15 {strides = array<i32>} : memref<128x128xf32, #tpu.memory_space<vmem>>, vector<128x128xf32>,
    } else {
    }
    %c128_i32 = arith.constant 128 : i32
    %3 = arith.muli %arg1, %c128_i32 : i32
    %4 = tpu.assume_multiple %3, 128 : i32
    %5 = arith.index_cast %4 : i32 to index
    %c0 = arith.constant 0 : index
    %6 = vector.load %arg3[%5, %c0] : memref<128x128xbf16, #tpu.memory_space<vmem>>, vector<128x128xbf16>
    %c0_1 = arith.constant 0 : index
    %c0_2 = arith.constant 0 : index
    %7 = vector.load %arg6[%c0_1, %c0_2] : memref<128x128xf32, #tpu.memory_space<vmem>>, vector<128x128xf32>
    %c0_3 = arith.constant 0 : index
    %c0_4 = arith.constant 0 : index
    %8 = vector.load %arg2[%c0_3, %c0_4] : memref<128x128xbf16, #tpu.memory_space<vmem>>, vector<128x128xbf16>
    %cst = arith.constant dense<0.000000e+00> : vector<128x128xf32>
    %9 = tpu.matmul %8, %6, %cst {dimension_numbers = #tpu.dot_dimension_numbers<[1], [0], [0], [1], [0, 0, 1, 1], [], []>} : vector<128x128xbf16>, vector<128x128xbf16>, vector<128x128xf32> -> vector<128x128xf32>
    %10 = arith.addf %7, %9 : vector<128x128xf32>
    %c0_5 = arith.constant 0 : index
    %c0_6 = arith.constant 0 : index
    %11 = vector.load %arg6[%c0_5, %c0_6] : memref<128x128xf32, #tpu.memory_space<vmem>>, vector<128x128xf32>
    tpu.vector_store %arg6[%c0_5, %c0_6], %10 {strides = array<i32>} : memref<128x128xf32, #tpu.memory_space<vmem>>, vector<128x128xf32>,
    %c0_i32_7 = arith.constant 0 : i32
    %12 = arith.cmpi eq, %arg1, %c0_i32_7 : i32
    %13 = arith.extui %12 : i1 to i32
    %c0_i32_8 = arith.constant 0 : i32
    %14 = arith.cmpi ne, %13, %c0_i32_8 : i32
    scf.if %14 {
      %c0_9 = arith.constant 0 : index
      %c0_10 = arith.constant 0 : index
      %15 = vector.load %arg6[%c0_9, %c0_10] : memref<128x128xf32, #tpu.memory_space<vmem>>, vector<128x128xf32>
      %c0_11 = arith.constant 0 : index
      %c0_12 = arith.constant 0 : index
      %16 = vector.load %arg4[%c0_11, %c0_12] : memref<1x128xf32, #tpu.memory_space<vmem>>, vector<1x128xf32>
      %17 = vector.broadcast %16 : vector<1x128xf32> to vector<128x128xf32>
      %18 = arith.addf %15, %17 : vector<128x128xf32>
      %c0_13 = arith.constant 0 : index
      %c0_14 = arith.constant 0 : index
      %19 = vector.load %arg5[%c0_13, %c0_14] : memref<128x128xf32, #tpu.memory_space<vmem>>, vector<128x128xf32>
      tpu.vector_store %arg5[%c0_13, %c0_14], %18 {strides = array<i32>} : memref<128x128xf32, #tpu.memory_space<vmem>>, vector<128x128xf32>,
    } else {
    }
    return
  }
  func.func @transform_0(%arg0: i32, %arg1: i32) -> (i32, i32) {
    %c0_i32 = arith.constant 0 : i32
    return %arg0, %arg1 : i32, i32
  }
  func.func @transform_1(%arg0: i32, %arg1: i32) -> (i32, i32) {
    %c0_i32 = arith.constant 0 : i32
    %c0_i32_0 = arith.constant 0 : i32
    %c0_i32_1 = arith.constant 0 : i32
    return %c0_i32, %c0_i32_0 : i32, i32
  }
  func.func @transform_2(%arg0: i32, %arg1: i32) -> (i32, i32) {
    %c0_i32 = arith.constant 0 : i32
    %c0_i32_0 = arith.constant 0 : i32
    %c0_i32_1 = arith.constant 0 : i32
    return %c0_i32, %c0_i32_0 : i32, i32
  }
  func.func @transform_3(%arg0: i32, %arg1: i32) -> (i32, i32) {
    %c0_i32 = arith.constant 0 : i32
    %c0_i32_0 = arith.constant 0 : i32
    return %arg0, %c0_i32 : i32, i32
  }
}

</mosaic_0001>

<bundles_post_ra>
// kernel: gnn_encoder_pallas.3
= control target key start
LH: loop header
LB: loop body
LE: loop exit
PB: predicated region body
PF: predicated region fallthrough
CT: control target
= control target key end

     0   :  { %s583_s1 = inlined_call_operand.vmem [shape: bf16[128,128], index: 1, kind: input, shape index: {}]   ;;  %s584_s0 = inlined_call_operand.vmem [shape: bf16[128,128], index: 0, kind: input, shape index: {}]   ;;  %s585_s2 = inlined_call_operand.vmem [shape: bf16[128,128], index: 2, kind: output, shape index: {}]  }
   0x1   :  { %v480_v0 = vld [vmem:[%s583_s1] sm:$0xff]   ;;  %v481_v1 = vld [vmem:[%s583_s1 + $0x8] sm:$0xff]   ;;  %v482_v2 = vld [vmem:[%s583_s1 + $0x10] sm:$0xff]  }
   0x2   :  { %432 = vmatprep.subr.bf16.mxu0 %v480_v0  ;;  %464 = vmatprep.subr.bf16.mxu1 %v480_v0  ;;  %v483_v3 = vld [vmem:[%s583_s1 + $0x18] sm:$0xff]   ;;  %v488_v4 = vld [vmem:[%s584_s0] sm:$0xff]   ;;  %v485_v7 = vld [vmem:[%s583_s1 + $0x28] sm:$0xff]  }
   0x3   :  { %433 = vmatpush3.bf16.msra.mxu0 %v480_v0  ;;  %472 = vmatpush3.bf16.msra.mxu1 %v480_v0  ;;  %v489_v5 = vld [vmem:[%s584_s0 + $0x20] sm:$0xff]   ;;  %v486_v8 = vld [vmem:[%s583_s1 + $0x30] sm:$0xff]   ;;  %v487_v9 = vld [vmem:[%s583_s1 + $0x38] sm:$0xff]  }
   0x4   :  { %434 = vmatprep.subr.bf16.mxu0 %v481_v1  ;;  %465 = vmatprep.subr.bf16.mxu1 %v481_v1  ;;  %v484_v6 = vld [vmem:[%s583_s1 + $0x20] sm:$0xff]   ;;  %v490_v10 = vld [vmem:[%s584_s0 + $0x8] sm:$0xff]   ;;  %v492_v12 = vld [vmem:[%s584_s0 + $0x10] sm:$0xff]  }
   0x5   :  { %448 = vmatprep.mubr.bf16.mxu0 %v488_v4  ;;  %456 = vmatprep.mubr.bf16.mxu1 %v489_v5  ;;  %v491_v11 = vld [vmem:[%s584_s0 + $0x28] sm:$0xff]   ;;  %v493_v13 = vld [vmem:[%s584_s0 + $0x30] sm:$0xff]   ;;  %v494_v14 = vld [vmem:[%s584_s0 + $0x18] sm:$0xff]  }
   0x6   :  { %v495_v15 = vld [vmem:[%s584_s0 + $0x38] sm:$0xff]  }
   0x7   :  { %435 = vmatpush3.bf16.msra.mxu0 %v481_v1  ;;  %473 = vmatpush3.bf16.msra.mxu1 %v481_v1 }
   0x8   :  { %436 = vmatprep.subr.bf16.mxu0 %v482_v2  ;;  %466 = vmatprep.subr.bf16.mxu1 %v482_v2 }
   0xb   :  { %437 = vmatpush3.bf16.msra.mxu0 %v482_v2  ;;  %474 = vmatpush3.bf16.msra.mxu1 %v482_v2 }
   0xc   :  { %438 = vmatprep.subr.bf16.mxu0 %v483_v3  ;;  %467 = vmatprep.subr.bf16.mxu1 %v483_v3 }
   0xf   :  { %439 = vmatpush3.bf16.msra.mxu0 %v483_v3  ;;  %475 = vmatpush3.bf16.msra.mxu1 %v483_v3 }
  0x10   :  { %440 = vmatprep.subr.bf16.mxu0 %v484_v6  ;;  %468 = vmatprep.subr.bf16.mxu1 %v484_v6 }
  0x13   :  { %441 = vmatpush3.bf16.msra.mxu0 %v484_v6  ;;  %476 = vmatpush3.bf16.msra.mxu1 %v484_v6 }
  0x14   :  { %442 = vmatprep.subr.bf16.mxu0 %v485_v7  ;;  %469 = vmatprep.subr.bf16.mxu1 %v485_v7 }
  0x17   :  { %443 = vmatpush3.bf16.msra.mxu0 %v485_v7  ;;  %477 = vmatpush3.bf16.msra.mxu1 %v485_v7 }
  0x18   :  { %444 = vmatprep.subr.bf16.mxu0 %v486_v8  ;;  %470 = vmatprep.subr.bf16.mxu1 %v486_v8 }
  0x1b   :  { %445 = vmatpush3.bf16.msra.mxu0 %v486_v8  ;;  %478 = vmatpush3.bf16.msra.mxu1 %v486_v8 }
  0x1c   :  { %446 = vmatprep.subr.bf16.mxu0 %v487_v9  ;;  %471 = vmatprep.subr.bf16.mxu1 %v487_v9 }
  0x1f   :  { %447 = vmatpush3.bf16.msra.mxu0 %v487_v9  ;;  %479 = vmatpush3.bf16.msra.mxu1 %v487_v9 }
  0x22   :  { %449 = vmatmul.mubr.bf16.vlgmr.msra.gmra.mrb[0].mxu0 %v490_v10  ;;  %457 = vmatmul.mubr.bf16.vlgmr.msra.gmra.mrb[0].mxu1 %v491_v11 }
  0x23   :  { %452 = vmatprep.mubr.bf16.mxu0 %v492_v12  ;;  %460 = vmatprep.mubr.bf16.mxu1 %v493_v13 }
  0x2a   :  { %453 = vmatmul.mubr.bf16.gmra.mrb[4].mxu0 %v494_v14  ;;  %461 = vmatmul.mubr.bf16.gmra.mrb[4].mxu1 %v495_v15 }
  0xf5   :  { %v450_v16 = vpop.f32.mrb[0].mxu0  ;;  %v458_v17 = vpop.f32.mrb[0].mxu1 }
  0xf6   :  { %v174_v18 = vpop.f32.mrb[1].mxu0  ;;  %v206_v19 = vpop.f32.mrb[1].mxu1 }
  0xf7   :  { %v451_v20 = vpop.f32.mrb[2].mxu0  ;;  %v459_v21 = vpop.f32.mrb[2].mxu1 }
  0xf8   :  { %v377_v22 = vpack.c.bf16 %v451_v20, %v450_v16  ;;  %v397_v23 = vpack.c.bf16 %v459_v21, %v458_v17  ;;  %v177_v24 = vpop.f32.mrb[3].mxu0  ;;  %v209_v25 = vpop.f32.mrb[3].mxu1 }
  0xf9   :  { %v372_v26 = vpack.c.bf16 %v177_v24, %v174_v18  ;;  %v392_v27 = vpack.c.bf16 %v209_v25, %v206_v19 }
  0xfa   :  { %409 = vst [vmem:[%s585_s2 + $0x8] sm:$0xff] %v377_v22   ;;  %413 = vst [vmem:[%s585_s2 + $0x28] sm:$0xff] %v397_v23  }
  0xfb   :  { %373 = vst [vmem:[%s585_s2] sm:$0xff] %v372_v26   ;;  %412 = vst [vmem:[%s585_s2 + $0x20] sm:$0xff] %v392_v27  }
  0xfd   :  { %v454_v28 = vpop.f32.mrb[4].mxu0  ;;  %v462_v29 = vpop.f32.mrb[4].mxu1 }
  0xfe   :  { %v190_v30 = vpop.f32.mrb[5].mxu0  ;;  %v222_v31 = vpop.f32.mrb[5].mxu1 }
  0xff   :  { %v455_v32 = vpop.f32.mrb[6].mxu0  ;;  %v463_v33 = vpop.f32.mrb[6].mxu1 }
 0x100   :  { %v387_v34 = vpack.c.bf16 %v455_v32, %v454_v28  ;;  %v407_v35 = vpack.c.bf16 %v463_v33, %v462_v29  ;;  %v193_v36 = vpop.f32.mrb[7].mxu0  ;;  %v225_v37 = vpop.f32.mrb[7].mxu1 }
 0x101   :  { %v382_v38 = vpack.c.bf16 %v193_v36, %v190_v30  ;;  %v402_v39 = vpack.c.bf16 %v225_v37, %v222_v31 }
 0x102   :  { %411 = vst [vmem:[%s585_s2 + $0x18] sm:$0xff] %v387_v34   ;;  %415 = vst [vmem:[%s585_s2 + $0x38] sm:$0xff] %v407_v35  }
 0x103   :  { %410 = vst [vmem:[%s585_s2 + $0x10] sm:$0xff] %v382_v38   ;;  %414 = vst [vmem:[%s585_s2 + $0x30] sm:$0xff] %v402_v39  }

// kernel: gnn_encoder_pallas.5
= control target key start
LH: loop header
LB: loop body
LE: loop exit
PB: predicated region body
PF: predicated region fallthrough
CT: control target
= control target key end

     0   :  { %s593_s1 = inlined_call_operand.vmem [shape: bf16[128,128], index: 1, kind: input, shape index: {}]   ;;  %s594_s0 = inlined_call_operand.vmem [shape: bf16[128,128], index: 0, kind: input, shape index: {}]   ;;  %s595_s2 = inlined_call_operand.vmem [shape: f32[1,128], index: 2, kind: input, shape index: {}]   ;;  %s596_s3 = inlined_call_operand.vmem [shape: f32[128,128], index: 3, kind: output, shape index: {}]  }
   0x1   :  { %v458_v0 = vld [vmem:[%s593_s1] sm:$0xff]   ;;  %v459_v1 = vld [vmem:[%s593_s1 + $0x8] sm:$0xff]   ;;  %v460_v2 = vld [vmem:[%s593_s1 + $0x10] sm:$0xff]  }
   0x2   :  { %410 = vmatprep.subr.bf16.mxu0 %v458_v0  ;;  %442 = vmatprep.subr.bf16.mxu1 %v458_v0  ;;  %v461_v3 = vld [vmem:[%s593_s1 + $0x18] sm:$0xff]   ;;  %v466_v4 = vld [vmem:[%s594_s0] sm:$0xff]   ;;  %v463_v7 = vld [vmem:[%s593_s1 + $0x28] sm:$0xff]  }
   0x3   :  { %411 = vmatpush3.bf16.msra.mxu0 %v458_v0  ;;  %450 = vmatpush3.bf16.msra.mxu1 %v458_v0  ;;  %v467_v5 = vld [vmem:[%s594_s0 + $0x20] sm:$0xff]   ;;  %v464_v8 = vld [vmem:[%s593_s1 + $0x30] sm:$0xff]   ;;  %v465_v9 = vld [vmem:[%s593_s1 + $0x38] sm:$0xff]  }
   0x4   :  { %412 = vmatprep.subr.bf16.mxu0 %v459_v1  ;;  %443 = vmatprep.subr.bf16.mxu1 %v459_v1  ;;  %v462_v6 = vld [vmem:[%s593_s1 + $0x20] sm:$0xff]   ;;  %v468_v10 = vld [vmem:[%s594_s0 + $0x8] sm:$0xff]   ;;  %v470_v12 = vld [vmem:[%s594_s0 + $0x10] sm:$0xff]  }
   0x5   :  { %426 = vmatprep.mubr.bf16.mxu0 %v466_v4  ;;  %434 = vmatprep.mubr.bf16.mxu1 %v467_v5  ;;  %v469_v11 = vld [vmem:[%s594_s0 + $0x28] sm:$0xff]   ;;  %v471_v13 = vld [vmem:[%s594_s0 + $0x30] sm:$0xff]   ;;  %v472_v14 = vld [vmem:[%s594_s0 + $0x18] sm:$0xff]  }
   0x6   :  { %v473_v15 = vld [vmem:[%s594_s0 + $0x38] sm:$0xff]   ;;  %v393_v16 = vld [vmem:[%s595_s2] ss:$0 sm:$0xff] }
   0x7   :  { %413 = vmatpush3.bf16.msra.mxu0 %v459_v1  ;;  %451 = vmatpush3.bf16.msra.mxu1 %v459_v1 }
   0x8   :  { %414 = vmatprep.subr.bf16.mxu0 %v460_v2  ;;  %444 = vmatprep.subr.bf16.mxu1 %v460_v2 }
   0xb   :  { %415 = vmatpush3.bf16.msra.mxu0 %v460_v2  ;;  %452 = vmatpush3.bf16.msra.mxu1 %v460_v2 }
   0xc   :  { %416 = vmatprep.subr.bf16.mxu0 %v461_v3  ;;  %445 = vmatprep.subr.bf16.mxu1 %v461_v3 }
   0xf   :  { %417 = vmatpush3.bf16.msra.mxu0 %v461_v3  ;;  %453 = vmatpush3.bf16.msra.mxu1 %v461_v3 }
  0x10   :  { %418 = vmatprep.subr.bf16.mxu0 %v462_v6  ;;  %446 = vmatprep.subr.bf16.mxu1 %v462_v6 }
  0x13   :  { %419 = vmatpush3.bf16.msra.mxu0 %v462_v6  ;;  %454 = vmatpush3.bf16.msra.mxu1 %v462_v6 }
  0x14   :  { %420 = vmatprep.subr.bf16.mxu0 %v463_v7  ;;  %447 = vmatprep.subr.bf16.mxu1 %v463_v7 }
  0x17   :  { %421 = vmatpush3.bf16.msra.mxu0 %v463_v7  ;;  %455 = vmatpush3.bf16.msra.mxu1 %v463_v7 }
  0x18   :  { %422 = vmatprep.subr.bf16.mxu0 %v464_v8  ;;  %448 = vmatprep.subr.bf16.mxu1 %v464_v8 }
  0x1b   :  { %423 = vmatpush3.bf16.msra.mxu0 %v464_v8  ;;  %456 = vmatpush3.bf16.msra.mxu1 %v464_v8 }
  0x1c   :  { %424 = vmatprep.subr.bf16.mxu0 %v465_v9  ;;  %449 = vmatprep.subr.bf16.mxu1 %v465_v9 }
  0x1f   :  { %425 = vmatpush3.bf16.msra.mxu0 %v465_v9  ;;  %457 = vmatpush3.bf16.msra.mxu1 %v465_v9 }
  0x22   :  { %427 = vmatmul.mubr.bf16.vlgmr.msra.gmra.mrb[0].mxu0 %v468_v10  ;;  %435 = vmatmul.mubr.bf16.vlgmr.msra.gmra.mrb[0].mxu1 %v469_v11 }
  0x23   :  { %430 = vmatprep.mubr.bf16.mxu0 %v470_v12  ;;  %438 = vmatprep.mubr.bf16.mxu1 %v471_v13 }
  0x2a   :  { %431 = vmatmul.mubr.bf16.gmra.mrb[4].mxu0 %v472_v14  ;;  %439 = vmatmul.mubr.bf16.gmra.mrb[4].mxu1 %v473_v15 }
  0xf5   :  { %v428_v17 = vpop.f32.mrb[0].mxu0  ;;  %v436_v18 = vpop.f32.mrb[0].mxu1 }
  0xf6   :  { %v341_v19 = vadd.f32 %v428_v17, %v393_v16  ;;  %v349_v20 = vadd.f32 %v436_v18, %v393_v16  ;;  %v218_v21 = vpop.f32.mrb[1].mxu0  ;;  %v250_v22 = vpop.f32.mrb[1].mxu1 }
  0xf7   :  { %v339_v23 = vadd.f32 %v393_v16, %v218_v21  ;;  %v347_v24 = vadd.f32 %v393_v16, %v250_v22  ;;  %v429_v25 = vpop.f32.mrb[2].mxu0  ;;  %v437_v26 = vpop.f32.mrb[2].mxu1 }
  0xf8   :  { %357 = vst [vmem:[%s596_s3 + $0x10] sm:$0xff] %v341_v19  ;;  %365 = vst [vmem:[%s596_s3 + $0x50] sm:$0xff] %v349_v20  ;;  %v342_v27 = vadd.f32 %v429_v25, %v393_v16  ;;  %v350_v28 = vadd.f32 %v437_v26, %v393_v16  ;;  %v221_v29 = vpop.f32.mrb[3].mxu0  ;;  %v253_v30 = vpop.f32.mrb[3].mxu1 }
  0xf9   :  { %355 = vst [vmem:[%s596_s3] sm:$0xff] %v339_v23  ;;  %363 = vst [vmem:[%s596_s3 + $0x40] sm:$0xff] %v347_v24  ;;  %v340_v31 = vadd.f32 %v393_v16, %v221_v29  ;;  %v348_v32 = vadd.f32 %v393_v16, %v253_v30 }
  0xfa   :  { %358 = vst [vmem:[%s596_s3 + $0x18] sm:$0xff] %v342_v27  ;;  %366 = vst [vmem:[%s596_s3 + $0x58] sm:$0xff] %v350_v28 }
  0xfb   :  { %356 = vst [vmem:[%s596_s3 + $0x8] sm:$0xff] %v340_v31  ;;  %364 = vst [vmem:[%s596_s3 + $0x48] sm:$0xff] %v348_v32 }
  0xfd   :  { %v432_v33 = vpop.f32.mrb[4].mxu0  ;;  %v440_v34 = vpop.f32.mrb[4].mxu1 }
  0xfe   :  { %v345_v35 = vadd.f32 %v432_v33, %v393_v16  ;;  %v353_v36 = vadd.f32 %v440_v34, %v393_v16  ;;  %v234_v37 = vpop.f32.mrb[5].mxu0  ;;  %v266_v38 = vpop.f32.mrb[5].mxu1 }
  0xff   :  { %v343_v39 = vadd.f32 %v393_v16, %v234_v37  ;;  %v351_v40 = vadd.f32 %v393_v16, %v266_v38  ;;  %v433_v41 = vpop.f32.mrb[6].mxu0  ;;  %v441_v42 = vpop.f32.mrb[6].mxu1 }
 0x100   :  { %361 = vst [vmem:[%s596_s3 + $0x30] sm:$0xff] %v345_v35  ;;  %369 = vst [vmem:[%s596_s3 + $0x70] sm:$0xff] %v353_v36  ;;  %v346_v43 = vadd.f32 %v433_v41, %v393_v16  ;;  %v354_v44 = vadd.f32 %v441_v42, %v393_v16  ;;  %v237_v45 = vpop.f32.mrb[7].mxu0  ;;  %v269_v46 = vpop.f32.mrb[7].mxu1 }
 0x101   :  { %359 = vst [vmem:[%s596_s3 + $0x20] sm:$0xff] %v343_v39  ;;  %367 = vst [vmem:[%s596_s3 + $0x60] sm:$0xff] %v351_v40  ;;  %v344_v47 = vadd.f32 %v393_v16, %v237_v45  ;;  %v352_v48 = vadd.f32 %v393_v16, %v269_v46 }
 0x102   :  { %362 = vst [vmem:[%s596_s3 + $0x38] sm:$0xff] %v346_v43  ;;  %370 = vst [vmem:[%s596_s3 + $0x78] sm:$0xff] %v354_v44 }
 0x103   :  { %360 = vst [vmem:[%s596_s3 + $0x28] sm:$0xff] %v344_v47  ;;  %368 = vst [vmem:[%s596_s3 + $0x68] sm:$0xff] %v352_v48 }

// kernel: gnn_encoder_pallas.4
= control target key start
LH: loop header
LB: loop body
LE: loop exit
PB: predicated region body
PF: predicated region fallthrough
CT: control target
= control target key end

     0   :  { %s977_s1 = inlined_call_operand.vmem [shape: bf16[128,128], index: 1, kind: input, shape index: {}]   ;;  %s978_s0 = inlined_call_operand.vmem [shape: bf16[128,128], index: 0, kind: input, shape index: {}]   ;;  %s979_s3 = inlined_call_operand.vmem [shape: bf16[128,128], index: 3, kind: input, shape index: {}]   ;;  %s980_s2 = inlined_call_operand.vmem [shape: f32[1,128], index: 2, kind: input, shape index: {}]   ;;  %s981_s4 = inlined_call_operand.vmem [shape: bf16[128,128], index: 4, kind: output, shape index: {}]  }
   0x1   :  { %v829_v0 = vld [vmem:[%s977_s1] sm:$0xff]   ;;  %v830_v1 = vld [vmem:[%s977_s1 + $0x8] sm:$0xff]   ;;  %v831_v2 = vld [vmem:[%s977_s1 + $0x10] sm:$0xff]  }
   0x2   :  { %765 = vmatprep.subr.bf16.mxu0 %v829_v0  ;;  %v832_v3 = vld [vmem:[%s977_s1 + $0x18] sm:$0xff]   ;;  %v837_v4 = vld [vmem:[%s978_s0] sm:$0xff]   ;;  %v834_v6 = vld [vmem:[%s977_s1 + $0x28] sm:$0xff]  }
   0x3   :  { %766 = vmatpush3.bf16.msra.mxu0 %v829_v0  ;;  %781 = vmatprep.mubr.bf16.mxu0 %v837_v4  ;;  %v833_v5 = vld [vmem:[%s977_s1 + $0x20] sm:$0xff]   ;;  %v846_v8 = vld [vmem:[%s979_s3 + $0x8] sm:$0xff]   ;;  %v835_v9 = vld [vmem:[%s977_s1 + $0x30] sm:$0xff]  }
   0x4   :  { %767 = vmatprep.subr.bf16.mxu0 %v830_v1  ;;  %v845_v7 = vld [vmem:[%s979_s3] sm:$0xff]   ;;  %v847_v10 = vld [vmem:[%s979_s3 + $0x10] sm:$0xff]   ;;  %v836_v11 = vld [vmem:[%s977_s1 + $0x38] sm:$0xff]  }
   0x5   :  { %797 = vmatprep.subr.bf16.mxu1 %v845_v7  ;;  %v848_v12 = vld [vmem:[%s979_s3 + $0x18] sm:$0xff]   ;;  %v849_v13 = vld [vmem:[%s979_s3 + $0x20] sm:$0xff]   ;;  %v838_v14 = vld [vmem:[%s978_s0 + $0x8] sm:$0xff]  }
   0x6   :  { %798 = vmatpush3.bf16.msra.mxu1 %v845_v7  ;;  %v839_v15 = vld [vmem:[%s978_s0 + $0x10] sm:$0xff]   ;;  %v850_v16 = vld [vmem:[%s979_s3 + $0x28] sm:$0xff]   ;;  %v840_v17 = vld [vmem:[%s978_s0 + $0x18] sm:$0xff]  }
   0x7   :  { %768 = vmatpush3.bf16.msra.mxu0 %v830_v1  ;;  %799 = vmatprep.subr.bf16.mxu1 %v846_v8  ;;  %v841_v18 = vld [vmem:[%s978_s0 + $0x20] sm:$0xff]   ;;  %v842_v19 = vld [vmem:[%s978_s0 + $0x28] sm:$0xff]   ;;  %v843_v20 = vld [vmem:[%s978_s0 + $0x30] sm:$0xff]  }
   0x8   :  { %769 = vmatprep.subr.bf16.mxu0 %v831_v2  ;;  %v844_v21 = vld [vmem:[%s978_s0 + $0x38] sm:$0xff]   ;;  %v851_v22 = vld [vmem:[%s979_s3 + $0x30] sm:$0xff]   ;;  %v645_v24 = vld [vmem:[%s980_s2] ss:$0 sm:$0xff] }
   0x9   :  { %v852_v23 = vld [vmem:[%s979_s3 + $0x38] sm:$0xff]  }
   0xa   :  { %800 = vmatpush3.bf16.msra.mxu1 %v846_v8 }
   0xb   :  { %770 = vmatpush3.bf16.msra.mxu0 %v831_v2  ;;  %801 = vmatprep.subr.bf16.mxu1 %v847_v10 }
   0xc   :  { %771 = vmatprep.subr.bf16.mxu0 %v832_v3 }
   0xe   :  { %802 = vmatpush3.bf16.msra.mxu1 %v847_v10 }
   0xf   :  { %772 = vmatpush3.bf16.msra.mxu0 %v832_v3  ;;  %803 = vmatprep.subr.bf16.mxu1 %v848_v12 }
  0x10   :  { %773 = vmatprep.subr.bf16.mxu0 %v833_v5 }
  0x12   :  { %804 = vmatpush3.bf16.msra.mxu1 %v848_v12 }
  0x13   :  { %774 = vmatpush3.bf16.msra.mxu0 %v833_v5  ;;  %805 = vmatprep.subr.bf16.mxu1 %v849_v13 }
  0x14   :  { %775 = vmatprep.subr.bf16.mxu0 %v834_v6 }
  0x16   :  { %806 = vmatpush3.bf16.msra.mxu1 %v849_v13 }
  0x17   :  { %776 = vmatpush3.bf16.msra.mxu0 %v834_v6  ;;  %807 = vmatprep.subr.bf16.mxu1 %v850_v16 }
  0x18   :  { %777 = vmatprep.subr.bf16.mxu0 %v835_v9 }
  0x1a   :  { %808 = vmatpush3.bf16.msra.mxu1 %v850_v16 }
  0x1b   :  { %778 = vmatpush3.bf16.msra.mxu0 %v835_v9  ;;  %809 = vmatprep.subr.bf16.mxu1 %v851_v22 }
  0x1c   :  { %779 = vmatprep.subr.bf16.mxu0 %v836_v11 }
  0x1e   :  { %810 = vmatpush3.bf16.msra.mxu1 %v851_v22 }
  0x1f   :  { %780 = vmatpush3.bf16.msra.mxu0 %v836_v11  ;;  %811 = vmatprep.subr.bf16.mxu1 %v852_v23 }
  0x22   :  { %782 = vmatmul.mubr.bf16.vlgmr.msra.gmra.mrb[0].mxu0 %v838_v14  ;;  %812 = vmatpush3.bf16.msra.mxu1 %v852_v23 }
  0x23   :  { %785 = vmatprep.mubr.bf16.mxu0 %v839_v15 }
  0x2a   :  { %786 = vmatmul.mubr.bf16.gmra.mrb[4].mxu0 %v840_v17 }
  0x2b   :  { %789 = vmatprep.mubr.bf16.mxu0 %v841_v18 }
  0x32   :  { %790 = vmatmul.mubr.bf16.gmra.mrb[8].mxu0 %v842_v19 }
  0x33   :  { %793 = vmatprep.mubr.bf16.mxu0 %v843_v20 }
  0x3a   :  { %794 = vmatmul.mubr.bf16.gmra.mrb[12].mxu0 %v844_v21 }
  0xf5   :  { %v783_v25 = vpop.f32.mrb[0].mxu0 }
  0xf6   :  { %v344_v26 = vadd.f32 %v783_v25, %v645_v24  ;;  %v221_v27 = vpop.f32.mrb[1].mxu0 }
  0xf7   :  { %v342_v28 = vadd.f32 %v645_v24, %v221_v27  ;;  %v784_v29 = vpop.f32.mrb[2].mxu0 }
  0xf8   :  { %v345_v30 = vadd.f32 %v784_v29, %v645_v24  ;;  %v224_v31 = vpop.f32.mrb[3].mxu0  ;;  %v360_v33 = vmax.f32 %v344_v26, 0.0 }
  0xf9   :  { %v343_v32 = vadd.f32 %v645_v24, %v224_v31  ;;  %v358_v35 = vmax.f32 %v342_v28, 0.0 }
  0xfa   :  { %v361_v34 = vmax.f32 %v345_v30, 0.0 }
  0xfb   :  { %v359_v36 = vmax.f32 %v343_v32, 0.0 }
  0xfc   :  { %v375_v37 = vpack.c.bf16 %v361_v34, %v360_v33 }
  0xfd   :  { %v787_v38 = vpop.f32.mrb[4].mxu0  ;;  %v374_v39 = vpack.c.bf16 %v359_v36, %v358_v35 }
  0xfe   :  { %v348_v40 = vadd.f32 %v787_v38, %v645_v24  ;;  %v237_v41 = vpop.f32.mrb[5].mxu0 }
  0xff   :  { %v346_v42 = vadd.f32 %v645_v24, %v237_v41  ;;  %v788_v43 = vpop.f32.mrb[6].mxu0  ;;  %813 = vmatprep.mubr.bf16.mxu1 %v374_v39 }
 0x100   :  { %v349_v44 = vadd.f32 %v788_v43, %v645_v24  ;;  %v240_v45 = vpop.f32.mrb[7].mxu0  ;;  %814 = vmatmul.mubr.bf16.vlgmr.msra.gmra.mrb[0].mxu1 %v375_v37  ;;  %v364_v47 = vmax.f32 %v348_v40, 0.0 }
 0x101   :  { %v347_v46 = vadd.f32 %v645_v24, %v240_v45  ;;  %v362_v49 = vmax.f32 %v346_v42, 0.0 }
 0x102   :  { %v365_v48 = vmax.f32 %v349_v44, 0.0 }
 0x103   :  { %v363_v50 = vmax.f32 %v347_v46, 0.0 }
 0x104   :  { %v377_v51 = vpack.c.bf16 %v365_v48, %v364_v47 }
 0x105   :  { %v376_v52 = vpack.c.bf16 %v363_v50, %v362_v49  ;;  %v791_v53 = vpop.f32.mrb[8].mxu0 }
 0x106   :  { %v352_v54 = vadd.f32 %v791_v53, %v645_v24  ;;  %v253_v55 = vpop.f32.mrb[9].mxu0 }
 0x107   :  { %v350_v56 = vadd.f32 %v645_v24, %v253_v55  ;;  %v792_v57 = vpop.f32.mrb[10].mxu0  ;;  %817 = vmatprep.mubr.bf16.mxu1 %v376_v52 }
 0x108   :  { %v353_v58 = vadd.f32 %v792_v57, %v645_v24  ;;  %v256_v59 = vpop.f32.mrb[11].mxu0  ;;  %818 = vmatmul.mubr.bf16.gmra.mrb[4].mxu1 %v377_v51  ;;  %v368_v61 = vmax.f32 %v352_v54, 0.0 }
 0x109   :  { %v351_v60 = vadd.f32 %v645_v24, %v256_v59  ;;  %v366_v63 = vmax.f32 %v350_v56, 0.0 }
 0x10a   :  { %v369_v62 = vmax.f32 %v353_v58, 0.0 }
 0x10b   :  { %v367_v0 = vmax.f32 %v351_v60, 0.0 }
 0x10c   :  { %v379_v1 = vpack.c.bf16 %v369_v62, %v368_v61 }
 0x10d   :  { %v378_v2 = vpack.c.bf16 %v367_v0, %v366_v63  ;;  %v795_v3 = vpop.f32.mrb[12].mxu0 }
 0x10e   :  { %v356_v4 = vadd.f32 %v795_v3, %v645_v24  ;;  %v269_v5 = vpop.f32.mrb[13].mxu0 }
 0x10f   :  { %v354_v6 = vadd.f32 %v645_v24, %v269_v5  ;;  %v796_v7 = vpop.f32.mrb[14].mxu0  ;;  %821 = vmatprep.mubr.bf16.mxu1 %v378_v2 }
 0x110   :  { %v357_v8 = vadd.f32 %v796_v7, %v645_v24  ;;  %v272_v9 = vpop.f32.mrb[15].mxu0  ;;  %822 = vmatmul.mubr.bf16.gmra.mrb[8].mxu1 %v379_v1  ;;  %v372_v11 = vmax.f32 %v356_v4, 0.0 }
 0x111   :  { %v355_v10 = vadd.f32 %v645_v24, %v272_v9  ;;  %v370_v13 = vmax.f32 %v354_v6, 0.0 }
 0x112   :  { %v373_v12 = vmax.f32 %v357_v8, 0.0 }
 0x113   :  { %v371_v14 = vmax.f32 %v355_v10, 0.0 }
 0x114   :  { %v381_v15 = vpack.c.bf16 %v373_v12, %v372_v11 }
 0x115   :  { %v380_v16 = vpack.c.bf16 %v371_v14, %v370_v13 }
 0x117   :  { %825 = vmatprep.mubr.bf16.mxu1 %v380_v16 }
 0x118   :  { %826 = vmatmul.mubr.bf16.gmra.mrb[12].mxu1 %v381_v15 }
 0x1d3   :  { %v815_v17 = vpop.f32.mrb[0].mxu1 }
 0x1d4   :  { %v480_v18 = vpop.f32.mrb[1].mxu1 }
 0x1d5   :  { %v816_v19 = vpop.f32.mrb[2].mxu1 }
 0x1d6   :  { %v694_v20 = vpack.c.bf16 %v816_v19, %v815_v17  ;;  %v483_v21 = vpop.f32.mrb[3].mxu1 }
 0x1d7   :  { %v689_v22 = vpack.c.bf16 %v483_v21, %v480_v18 }
 0x1d8   :  { %726 = vst [vmem:[%s981_s4 + $0x8] sm:$0xff] %v694_v20  }
 0x1d9   :  { %690 = vst [vmem:[%s981_s4] sm:$0xff] %v689_v22  }
 0x1db   :  { %v819_v23 = vpop.f32.mrb[4].mxu1 }
 0x1dc   :  { %v496_v24 = vpop.f32.mrb[5].mxu1 }
 0x1dd   :  { %v820_v25 = vpop.f32.mrb[6].mxu1 }
 0x1de   :  { %v704_v26 = vpack.c.bf16 %v820_v25, %v819_v23  ;;  %v499_v27 = vpop.f32.mrb[7].mxu1 }
 0x1df   :  { %v699_v28 = vpack.c.bf16 %v499_v27, %v496_v24 }
 0x1e0   :  { %728 = vst [vmem:[%s981_s4 + $0x18] sm:$0xff] %v704_v26  }
 0x1e1   :  { %727 = vst [vmem:[%s981_s4 + $0x10] sm:$0xff] %v699_v28  }
 0x1e3   :  { %v823_v29 = vpop.f32.mrb[8].mxu1 }
 0x1e4   :  { %v512_v30 = vpop.f32.mrb[9].mxu1 }
 0x1e5   :  { %v824_v31 = vpop.f32.mrb[10].mxu1 }
 0x1e6   :  { %v714_v32 = vpack.c.bf16 %v824_v31, %v823_v29  ;;  %v515_v33 = vpop.f32.mrb[11].mxu1 }
 0x1e7   :  { %v709_v34 = vpack.c.bf16 %v515_v33, %v512_v30 }
 0x1e8   :  { %730 = vst [vmem:[%s981_s4 + $0x28] sm:$0xff] %v714_v32  }
 0x1e9   :  { %729 = vst [vmem:[%s981_s4 + $0x20] sm:$0xff] %v709_v34  }
 0x1eb   :  { %v827_v35 = vpop.f32.mrb[12].mxu1 }
 0x1ec   :  { %v528_v36 = vpop.f32.mrb[13].mxu1 }
 0x1ed   :  { %v828_v37 = vpop.f32.mrb[14].mxu1 }
 0x1ee   :  { %v724_v38 = vpack.c.bf16 %v828_v37, %v827_v35  ;;  %v531_v39 = vpop.f32.mrb[15].mxu1 }
 0x1ef   :  { %v719_v40 = vpack.c.bf16 %v531_v39, %v528_v36 }
 0x1f0   :  { %732 = vst [vmem:[%s981_s4 + $0x38] sm:$0xff] %v724_v38  }
 0x1f1   :  { %731 = vst [vmem:[%s981_s4 + $0x30] sm:$0xff] %v719_v40  }

</bundles_post_ra>
